<compile_context>
chip_gen: v7x
topology: tpu7x:2x2x1
jax: 0.10.0
libtpu: 0.0.40
codegen_flags: <defaults>
</compile_context>

<pallas_src>
import functools

import jax
import jax.numpy as jnp
from jax.experimental import pallas as pl
from jax.experimental.pallas import tpu as pltpu

DROPOUT_P = 0.1
INV_SCALE_FACTOR = 1.0 / 64.0  # forward does qk.div(inv_scale_factor) == qk * 64


def _sdpa_dropout_kernel(q_ref, k_ref, v_ref, u_ref, o_ref, *,
                         dropout_p, inv_scale_factor):
    q = q_ref[...]  # (BH, S, D) f32
    k = k_ref[...]  # (BH, S, D)
    v = v_ref[...]  # (BH, S, D)

    # scores = q @ k^T; the transpose is expressed as a contraction over the
    # last dim of both operands (MXU consumes K directly, no XLU vxpose).
    s = jnp.einsum('bqd,bkd->bqk', q, k, preferred_element_type=jnp.float32)
    s = s * jnp.float32(1.0 / inv_scale_factor)  # .div(inv_scale_factor)

    # softmax over the last axis
    m = jnp.max(s, axis=-1, keepdims=True)
    e = jnp.exp(s - m)
    denom = jnp.sum(e, axis=-1, keepdims=True)

    if dropout_p > 0.0:
        # F.dropout training semantics: zero w.p. p, scale kept values by 1/(1-p).
        # Fold the rescale into the (S,1) denominator column (cheap VPU work).
        inv = jnp.float32(1.0 / (1.0 - dropout_p)) / denom
        keep = u_ref[...] >= jnp.float32(dropout_p)
        p = jnp.where(keep, e * inv, jnp.zeros_like(e))
    else:
        p = e / denom

    out = jnp.einsum('bqk,bkd->bqd', p.astype(v.dtype), v,
                     preferred_element_type=jnp.float32)
    o_ref[...] = out.astype(o_ref.dtype)


def sdpa_dropout(query, key, value, *, rng_key=None,
                 dropout_p=DROPOUT_P, inv_scale_factor=INV_SCALE_FACTOR):
    B, H, S, D = query.shape
    BH = B * H
    qf = query.reshape(BH, S, D)
    kf = key.reshape(BH, S, D)
    vf = value.reshape(BH, S, D)

    if dropout_p > 0.0:
        if rng_key is None:
            rng_key = jax.random.PRNGKey(0)
        # Host-side uniforms; the dropout mask/rescale is applied inside the kernel.
        u = jax.random.uniform(rng_key, (BH, S, S), dtype=jnp.float32)
    else:
        u = jnp.zeros((BH, S, S), dtype=jnp.float32)

    kernel = functools.partial(_sdpa_dropout_kernel,
                               dropout_p=dropout_p,
                               inv_scale_factor=inv_scale_factor)

    full = lambda i: (0, 0, 0)  # single program owns the whole slab
    out = pl.pallas_call(
        kernel,
        out_shape=jax.ShapeDtypeStruct((BH, S, D), query.dtype),
        grid=(1,),
        in_specs=[
            pl.BlockSpec((BH, S, D), full),
            pl.BlockSpec((BH, S, D), full),
            pl.BlockSpec((BH, S, D), full),
            pl.BlockSpec((BH, S, S), full),
        ],
        out_specs=pl.BlockSpec((BH, S, D), full),
        compiler_params=pltpu.CompilerParams(
            dimension_semantics=("arbitrary",)),
    )(qf, kf, vf, u)
    return out.reshape(B, H, S, D)


if __name__ == "__main__":
    # Shapes consistent with the module: (1, 3, 64, 64)
    B, H, S, D = 1, 3, 64, 64
    rng = jax.random.PRNGKey(0)
    kq, kk, kv, kd = jax.random.split(rng, 4)
    query = jax.random.normal(kq, (B, H, S, D), dtype=jnp.float32)
    key = jax.random.normal(kk, (B, H, S, D), dtype=jnp.float32)
    value = jax.random.normal(kv, (B, H, S, D), dtype=jnp.float32)

    out = sdpa_dropout(query, key, value, rng_key=kd)
    jax.block_until_ready(out)
    assert out.shape == (B, H, S, D)
    assert bool(jnp.all(jnp.isfinite(out)))
    print("KERNEL_OK")
</pallas_src>

<mosaic_0001>
module attributes {stable_mosaic.version = 11 : i64} {
  func.func @_sdpa_dropout_kernel(%arg0: i32, %arg1: memref<3x64x64xf32, #tpu.memory_space<vmem>>, %arg2: memref<3x64x64xf32, #tpu.memory_space<vmem>>, %arg3: memref<3x64x64xf32, #tpu.memory_space<vmem>>, %arg4: memref<3x64x64xf32, #tpu.memory_space<vmem>>, %arg5: memref<3x64x64xf32, #tpu.memory_space<vmem>>) attributes {dimension_semantics = [#tpu.dimension_semantics<arbitrary>], iteration_bounds = array<i64: 1>, scalar_prefetch = 0 : i64, scratch_operands = 0 : i64, tpu.core_type = #tpu.core_type<tc>, window_params = [{pipeline_mode = #tpu.pipeline_mode<synchronous>, transform_indices = @transform_0, window_bounds = array<i64: 3, 64, 64>}, {pipeline_mode = #tpu.pipeline_mode<synchronous>, transform_indices = @transform_1, window_bounds = array<i64: 3, 64, 64>}, {pipeline_mode = #tpu.pipeline_mode<synchronous>, transform_indices = @transform_2, window_bounds = array<i64: 3, 64, 64>}, {pipeline_mode = #tpu.pipeline_mode<synchronous>, transform_indices = @transform_3, window_bounds = array<i64: 3, 64, 64>}, {pipeline_mode = #tpu.pipeline_mode<synchronous>, transform_indices = @transform_4, window_bounds = array<i64: 3, 64, 64>}]} {
    %c0 = arith.constant 0 : index
    %c0_0 = arith.constant 0 : index
    %c0_1 = arith.constant 0 : index
    %0 = vector.load %arg1[%c0, %c0_0, %c0_1] : memref<3x64x64xf32, #tpu.memory_space<vmem>>, vector<3x64x64xf32>
    %c0_2 = arith.constant 0 : index
    %c0_3 = arith.constant 0 : index
    %c0_4 = arith.constant 0 : index
    %1 = vector.load %arg2[%c0_2, %c0_3, %c0_4] : memref<3x64x64xf32, #tpu.memory_space<vmem>>, vector<3x64x64xf32>
    %c0_5 = arith.constant 0 : index
    %c0_6 = arith.constant 0 : index
    %c0_7 = arith.constant 0 : index
    %2 = vector.load %arg3[%c0_5, %c0_6, %c0_7] : memref<3x64x64xf32, #tpu.memory_space<vmem>>, vector<3x64x64xf32>
    "tpu.trace_start"() <{level = 10 : i32, message = "bqd,bkd->bqk"}> : () -> ()
    %cst = arith.constant dense<0.000000e+00> : vector<3x64x64xf32>
    %3 = tpu.matmul %0, %1, %cst {dimension_numbers = #tpu.dot_dimension_numbers<[2], [2], [1], [1], [0, 0, 0, 1, 1, 1], [0], [0]>} : vector<3x64x64xf32>, vector<3x64x64xf32>, vector<3x64x64xf32> -> vector<3x64x64xf32>
    "tpu.trace_stop"() : () -> ()
    %cst_8 = arith.constant 6.400000e+01 : f32
    %4 = vector.broadcast %cst_8 : f32 to vector<3x64x64xf32>
    %5 = arith.mulf %3, %4 : vector<3x64x64xf32>
    %cst_9 = arith.constant dense<0xFF800000> : vector<3x64xf32>
    %6 = vector.multi_reduction <maximumf>, %5, %cst_9 [2] : vector<3x64x64xf32> to vector<3x64xf32>
    %7 = vector.shape_cast %6 : vector<3x64xf32> to vector<3x64x1xf32>
    %8 = vector.broadcast %7 : vector<3x64x1xf32> to vector<3x64x64xf32>
    %9 = arith.subf %5, %8 : vector<3x64x64xf32>
    %10 = math.exp %9 : vector<3x64x64xf32>
    %cst_10 = arith.constant dense<0.000000e+00> : vector<3x64xf32>
    %11 = vector.multi_reduction <add>, %10, %cst_10 [2] : vector<3x64x64xf32> to vector<3x64xf32>
    %12 = vector.shape_cast %11 : vector<3x64xf32> to vector<3x64x1xf32>
    %cst_11 = arith.constant 1.11111116 : f32
    %13 = vector.broadcast %cst_11 : f32 to vector<3x64x1xf32>
    %14 = arith.divf %13, %12 : vector<3x64x1xf32>
    %c0_12 = arith.constant 0 : index
    %c0_13 = arith.constant 0 : index
    %c0_14 = arith.constant 0 : index
    %15 = vector.load %arg4[%c0_12, %c0_13, %c0_14] : memref<3x64x64xf32, #tpu.memory_space<vmem>>, vector<3x64x64xf32>
    %cst_15 = arith.constant 1.000000e-01 : f32
    %16 = vector.broadcast %cst_15 : f32 to vector<3x64x64xf32>
    %17 = arith.cmpf oge, %15, %16 : vector<3x64x64xf32>
    %18 = vector.broadcast %14 : vector<3x64x1xf32> to vector<3x64x64xf32>
    %19 = arith.mulf %10, %18 : vector<3x64x64xf32>
    %cst_16 = arith.constant 0.000000e+00 : f32
    %20 = vector.broadcast %cst_16 : f32 to vector<3x64x64xf32>
    %21 = arith.select %17, %19, %20 : vector<3x64x64xi1>, vector<3x64x64xf32>
    "tpu.trace_start"() <{level = 10 : i32, message = "bqk,bkd->bqd"}> : () -> ()
    %cst_17 = arith.constant dense<0.000000e+00> : vector<3x64x64xf32>
    %22 = tpu.matmul %21, %2, %cst_17 {dimension_numbers = #tpu.dot_dimension_numbers<[2], [1], [1], [2], [0, 0, 0, 1, 1, 2], [0], [0]>} : vector<3x64x64xf32>, vector<3x64x64xf32>, vector<3x64x64xf32> -> vector<3x64x64xf32>
    "tpu.trace_stop"() : () -> ()
    %c0_18 = arith.constant 0 : index
    %c0_19 = arith.constant 0 : index
    %c0_20 = arith.constant 0 : index
    %23 = vector.load %arg5[%c0_18, %c0_19, %c0_20] : memref<3x64x64xf32, #tpu.memory_space<vmem>>, vector<3x64x64xf32>
    tpu.vector_store %arg5[%c0_18, %c0_19, %c0_20], %22 {strides = array<i32>} : memref<3x64x64xf32, #tpu.memory_space<vmem>>, vector<3x64x64xf32>,
    return
  }
  func.func @transform_0(%arg0: i32) -> (i32, i32, i32) {
    %c0_i32 = arith.constant 0 : i32
    %c0_i32_0 = arith.constant 0 : i32
    %c0_i32_1 = arith.constant 0 : i32
    %c0_i32_2 = arith.constant 0 : i32
    return %c0_i32, %c0_i32_0, %c0_i32_1 : i32, i32, i32
  }
  func.func @transform_1(%arg0: i32) -> (i32, i32, i32) {
    %c0_i32 = arith.constant 0 : i32
    %c0_i32_0 = arith.constant 0 : i32
    %c0_i32_1 = arith.constant 0 : i32
    %c0_i32_2 = arith.constant 0 : i32
    return %c0_i32, %c0_i32_0, %c0_i32_1 : i32, i32, i32
  }
  func.func @transform_2(%arg0: i32) -> (i32, i32, i32) {
    %c0_i32 = arith.constant 0 : i32
    %c0_i32_0 = arith.constant 0 : i32
    %c0_i32_1 = arith.constant 0 : i32
    %c0_i32_2 = arith.constant 0 : i32
    return %c0_i32, %c0_i32_0, %c0_i32_1 : i32, i32, i32
  }
  func.func @transform_3(%arg0: i32) -> (i32, i32, i32) {
    %c0_i32 = arith.constant 0 : i32
    %c0_i32_0 = arith.constant 0 : i32
    %c0_i32_1 = arith.constant 0 : i32
    %c0_i32_2 = arith.constant 0 : i32
    return %c0_i32, %c0_i32_0, %c0_i32_1 : i32, i32, i32
  }
  func.func @transform_4(%arg0: i32) -> (i32, i32, i32) {
    %c0_i32 = arith.constant 0 : i32
    %c0_i32_0 = arith.constant 0 : i32
    %c0_i32_1 = arith.constant 0 : i32
    %c0_i32_2 = arith.constant 0 : i32
    return %c0_i32, %c0_i32_0, %c0_i32_1 : i32, i32, i32
  }
}

</mosaic_0001>

<bundles_post_ra>
// kernel: tpu_custom_call.1
= control target key start
LH: loop header
LB: loop body
LE: loop exit
PB: predicated region body
PF: predicated region fallthrough
CT: control target
= control target key end

     0   :  { %9 = vsyncpa [#allocation3], 0  ;;  %s2622_s0 = inlined_call_operand.hbm [shape: f32[3,64,64], index: 0, kind: input, shape index: {}]   ;;  %s2623_s1 = inlined_call_operand.hbm [shape: f32[3,64,64], index: 1, kind: input, shape index: {}]   ;;  %s2624_s2 = inlined_call_operand.hbm [shape: f32[3,64,64], index: 2, kind: input, shape index: {}]   ;;  %s2625_s3 = inlined_call_operand.hbm [shape: f32[3,64,64], index: 3, kind: input, shape index: {}]   ;;  %s2626_s4 = inlined_call_operand.hbm [shape: f32[3,64,64], index: 4, kind: output, shape index: {}]  }
   0x1   :  { %10 = vsyncpa [#allocation6], 0 }
   0x2   :  { %11 = vsyncpa [#allocation9], 0 }
   0x3   :  { %12 = vsyncpa [#allocation4], 0  ;;  %s2104_s15 = smov [#allocation5]   ;;  %s2105_s17 = smov [#allocation2]  }
   0x4   :  { %s30_s16 = sshll.u32 %s2104_s15, 4  ;;  %s18_s18 = sshll.u32 %s2105_s17, 4  ;;  %s31_s16 = int_to_ptr.vmem [resolvable:$true] %s30_s16  ;;  %s2136_s18 = int_to_ptr.vmem [resolvable:$true] %s18_s18 }
   0x5   :  { %s1986_s21 = scalar_lea.hbm %s2623_s1, 3072 }
   0x6   :  { %p1987_p0 = scmp.ne.s32.totalorder %s2623_s1, %s1986_s21  ;;  %p1990_p1 = scmp.lt.u32.totalorder %s1986_s21, %s2623_s1 }
   0x8   :  { %p1992_p2 = pnand %p1990_p1, %p1987_p0 }
   0xa   :  { %1995 = shalt.err (!%p1992_p2)
}
   0xb   :  { %s1996_s26 = scalar_lea.vmem %s31_s16, 3072  ;;  %p2001_p4 = scmp.lt.s32.totalorder %s31_s16, %s31_s16 }
   0xc   :  { %p1997_p3 = scmp.ne.s32.totalorder %s31_s16, %s1996_s26  ;;  %p2002_p5 = scmp.lt.s32.totalorder %s1996_s26, %s1996_s26 }
   0xe   :  { %p2003_p6 = por %p2002_p5, %p2001_p4 }
  0x10   :  { %p2004_p7 = pnand %p2003_p6, %p1997_p3 }
  0x12   :  { %2007 = shalt.err (!%p2004_p7)
}
  0x13   :  { %s2106_s27 = smov 128   ;;  %s2107_s28 = smov 8  }
  0x14   :  { %36 = dma.hbm_to_vmem [thread:$0]  %s2623_s1, 3072, %s31_s16, [#allocation6], %s2106_s27, %s2106_s27, %s2107_s28  }
  0x15   :  { %s2008_s7 = scalar_lea.hbm %s2622_s0, 3072 }
  0x16   :  { %p2009_p8 = scmp.ne.s32.totalorder %s2622_s0, %s2008_s7  ;;  %p2012_p9 = scmp.lt.u32.totalorder %s2008_s7, %s2622_s0 }
  0x18   :  { %p2014_p10 = pnand %p2012_p9, %p2009_p8 }
  0x1a   :  { %2017 = shalt.err (!%p2014_p10)
}
  0x1b   :  { %s2018_s12 = scalar_lea.vmem %s2136_s18, 3072  ;;  %p2023_p12 = scmp.lt.s32.totalorder %s2136_s18, %s2136_s18 }
  0x1c   :  { %p2019_p11 = scmp.ne.s32.totalorder %s2136_s18, %s2018_s12  ;;  %p2024_p13 = scmp.lt.s32.totalorder %s2018_s12, %s2018_s12 }
  0x1e   :  { %p2025_p0 = por %p2024_p13, %p2023_p12 }
  0x20   :  { %p2026_p1 = pnand %p2025_p0, %p2019_p11 }
  0x22   :  { %2029 = shalt.err (!%p2026_p1)
}
  0x23   :  { %24 = dma.hbm_to_vmem [thread:$0]  %s2622_s0, 3072, %s2136_s18, [#allocation3], %s2106_s27, %s2106_s27, %s2107_s28  }
  0x24   :  { %s2108_s14 = smov [#allocation7]   ;;  %s2109_s16 = smov [#allocation8]  }
  0x25   :  { %s42_s15 = sshll.u32 %s2108_s14, 4  ;;  %s54_s17 = sshll.u32 %s2109_s16, 4  ;;  %s43_s15 = int_to_ptr.vmem [resolvable:$true] %s42_s15  ;;  %s2173_s17 = int_to_ptr.vmem [resolvable:$true] %s54_s17 }
  0x26   :  { %s2030_s21 = scalar_lea.hbm %s2624_s2, 3072 }
  0x27   :  { %p2031_p2 = scmp.ne.s32.totalorder %s2624_s2, %s2030_s21  ;;  %p2034_p3 = scmp.lt.u32.totalorder %s2030_s21, %s2624_s2 }
  0x29   :  { %p2036_p4 = pnand %p2034_p3, %p2031_p2 }
  0x2b   :  { %2039 = shalt.err (!%p2036_p4)
}
  0x2c   :  { %s2040_s0 = scalar_lea.vmem %s43_s15, 3072  ;;  %p2045_p6 = scmp.lt.s32.totalorder %s43_s15, %s43_s15 }
  0x2d   :  { %p2041_p5 = scmp.ne.s32.totalorder %s43_s15, %s2040_s0  ;;  %p2046_p7 = scmp.lt.s32.totalorder %s2040_s0, %s2040_s0 }
  0x2f   :  { %p2047_p8 = por %p2046_p7, %p2045_p6 }
  0x31   :  { %p2048_p9 = pnand %p2047_p8, %p2041_p5 }
  0x33   :  { %2051 = shalt.err (!%p2048_p9)
}
  0x34   :  { %48 = dma.hbm_to_vmem [thread:$0]  %s2624_s2, 3072, %s43_s15, [#allocation6], %s2106_s27, %s2106_s27, %s2107_s28  }
  0x35   :  { %s2052_s5 = scalar_lea.hbm %s2625_s3, 3072 }
  0x36   :  { %p2053_p10 = scmp.ne.s32.totalorder %s2625_s3, %s2052_s5  ;;  %p2056_p11 = scmp.lt.u32.totalorder %s2052_s5, %s2625_s3 }
  0x38   :  { %p2058_p12 = pnand %p2056_p11, %p2053_p10 }
  0x3a   :  { %2061 = shalt.err (!%p2058_p12)
}
  0x3b   :  { %s2062_s10 = scalar_lea.vmem %s2173_s17, 3072  ;;  %p2067_p0 = scmp.lt.s32.totalorder %s2173_s17, %s2173_s17 }
  0x3c   :  { %p2063_p13 = scmp.ne.s32.totalorder %s2173_s17, %s2062_s10  ;;  %p2068_p1 = scmp.lt.s32.totalorder %s2062_s10, %s2062_s10 }
  0x3e   :  { %p2069_p2 = por %p2068_p1, %p2067_p0 }
  0x40   :  { %p2070_p3 = pnand %p2069_p2, %p2063_p13 }
  0x42   :  { %2073 = shalt.err (!%p2070_p3)
}
  0x43   :  { %60 = dma.hbm_to_vmem [thread:$0]  %s2625_s3, 3072, %s2173_s17, [#allocation9], %s2106_s27, %s2106_s27, %s2107_s28  }
  0x44   :  { %2096 = dma.done.wait [#allocation3], 3072  }
  0x45   :  { %2097 = vsyncadd [#allocation3], 4294964224 }
  0x46   :  { %2098 = dma.done.wait [#allocation6], 6144  }
  0x47   :  { %2099 = vsyncadd [#allocation6], 4294961152 }
  0x48   :  { %2100 = dma.done.wait [#allocation9], 3072  }
  0x49   :  { %2101 = vsyncadd [#allocation9], 4294964224  ;;  %vm145_vm0 = vcmask 523264   ;;  %v97_v1 = vld [vmem:[#allocation5] sm:$0xff]  ;;  %v98_v2 = vld [vmem:[#allocation5 + $0x8] sm:$0xff]  ;;  %s2110_s3 = smov [#allocation10]  }
  0x4a   :  { %vm2212_vm1 = vmpackc.low %vm145_vm0, %vm145_vm0  ;;  %v105_v3 = vld [vmem:[#allocation5 + $0x40] sm:$0xff]  ;;  %v1755_v4 = vpack.c.bf16 %v98_v2, %v97_v1  ;;  %v106_v5 = vld [vmem:[#allocation5 + $0x48] sm:$0xff]  ;;  %s1405_s12 = sshll.u32 %s2110_s3, 4  ;;  %s1406_s12 = int_to_ptr.vmem [resolvable:$true] %s1405_s12 }
  0x4b   :  { %v99_v6 = vld [vmem:[#allocation5 + $0x10] sm:$0xff]  ;;  %v100_v7 = vld [vmem:[#allocation5 + $0x18] sm:$0xff]  ;;  %v1779_v8 = vpack.c.bf16 %v106_v5, %v105_v3  ;;  %v73_v13 = vld [vmem:[#allocation2] sm:$0xff]  ;;  %s2074_s1 = scalar_lea.vmem %s1406_s12, 3072  ;;  %p2079_p5 = scmp.lt.s32.totalorder %s1406_s12, %s1406_s12 }
  0x4c   :  { %v1761_v9 = vpack.c.bf16 %v100_v7, %v99_v6  ;;  %v107_v10 = vld [vmem:[#allocation5 + $0x50] sm:$0xff]  ;;  %v108_v11 = vld [vmem:[#allocation5 + $0x58] sm:$0xff]  ;;  %1757 = vmatprep.subr.msk.bf16.mxu0 %vm2212_vm1, %v1755_v4  ;;  %v81_v14 = vld [vmem:[#allocation2 + $0x40] sm:$0xff]  ;;  %1603 = vmatprep.mubr.msk.f32.mxu0 %vm145_vm0, %v73_v13  ;;  %p2075_p4 = scmp.ne.s32.totalorder %s1406_s12, %s2074_s1  ;;  %p2080_p6 = scmp.lt.s32.totalorder %s2074_s1, %s2074_s1 }
  0x4d   :  { %v1785_v12 = vpack.c.bf16 %v108_v11, %v107_v10  ;;  %1781 = vmatprep.subr.msk.bf16.mxu1 %vm2212_vm1, %v1779_v8  ;;  %1760 = vmatpush3.bf16.xpose.msk.msra.mxu0 %vm2212_vm1, %v1755_v4  ;;  %v101_v15 = vld [vmem:[#allocation5 + $0x20] sm:$0xff]  ;;  %v102_v16 = vld [vmem:[#allocation5 + $0x28] sm:$0xff]  ;;  %v103_v21 = vld [vmem:[#allocation5 + $0x30] sm:$0xff] }
  0x4e   :  { %1784 = vmatpush3.bf16.xpose.msk.msra.mxu1 %vm2212_vm1, %v1779_v8  ;;  %1763 = vmatprep.subr.msk.bf16.mxu0 %vm2212_vm1, %v1761_v9  ;;  %v109_v17 = vld [vmem:[#allocation5 + $0x60] sm:$0xff]  ;;  %v110_v18 = vld [vmem:[#allocation5 + $0x68] sm:$0xff]  ;;  %v1767_v19 = vpack.c.bf16 %v102_v16, %v101_v15  ;;  %v104_v22 = vld [vmem:[#allocation5 + $0x38] sm:$0xff]  ;;  %p2081_p7 = por %p2080_p6, %p2079_p5 }
  0x4f   :  { %1787 = vmatprep.subr.msk.bf16.mxu1 %vm2212_vm1, %v1785_v12  ;;  %1631 = vmatprep.mubr.msk.f32.mxu1 %vm145_vm0, %v81_v14  ;;  %v1791_v20 = vpack.c.bf16 %v110_v18, %v109_v17  ;;  %v111_v23 = vld [vmem:[#allocation5 + $0x70] sm:$0xff]  ;;  %v112_v24 = vld [vmem:[#allocation5 + $0x78] sm:$0xff]  ;;  %v1773_v25 = vpack.c.bf16 %v104_v22, %v103_v21  ;;  %v113_v27 = vld [vmem:[#allocation5 + $0x80] sm:$0xff] }
  0x50   :  { %v1797_v26 = vpack.c.bf16 %v112_v24, %v111_v23  ;;  %v114_v28 = vld [vmem:[#allocation5 + $0x88] sm:$0xff]  ;;  %v115_v30 = vld [vmem:[#allocation5 + $0x90] sm:$0xff]  ;;  %v116_v31 = vld [vmem:[#allocation5 + $0x98] sm:$0xff]  ;;  %p2082_p8 = pnand %p2081_p7, %p2075_p4 }
  0x51   :  { %v1803_v29 = vpack.c.bf16 %v114_v28, %v113_v27  ;;  %v74_v32 = vld [vmem:[#allocation2 + $0x8] sm:$0xff]  ;;  %v1809_v34 = vpack.c.bf16 %v116_v31, %v115_v30  ;;  %v75_v35 = vld [vmem:[#allocation2 + $0x10] sm:$0xff]  ;;  %v76_v37 = vld [vmem:[#allocation2 + $0x18] sm:$0xff] }
  0x52   :  { %v82_v33 = vld [vmem:[#allocation2 + $0x48] sm:$0xff]  ;;  %v83_v36 = vld [vmem:[#allocation2 + $0x50] sm:$0xff]  ;;  %v77_v38 = vld [vmem:[#allocation2 + $0x20] sm:$0xff] }
  0x53   :  { %v84_v39 = vld [vmem:[#allocation2 + $0x58] sm:$0xff]  ;;  %v117_v40 = vld [vmem:[#allocation5 + $0xa0] sm:$0xff]  ;;  %v118_v41 = vld [vmem:[#allocation5 + $0xa8] sm:$0xff] }
  0x54   :  { %v85_v42 = vld [vmem:[#allocation2 + $0x60] sm:$0xff]  ;;  %v78_v43 = vld [vmem:[#allocation2 + $0x28] sm:$0xff]  ;;  %v79_v44 = vld [vmem:[#allocation2 + $0x30] sm:$0xff]  ;;  %v1815_v45 = vpack.c.bf16 %v118_v41, %v117_v40 }
  0x55   :  { %1766 = vmatpush3.bf16.xpose.msk.msra.mxu0 %vm2212_vm1, %v1761_v9  ;;  %v86_v46 = vld [vmem:[#allocation2 + $0x68] sm:$0xff]  ;;  %v87_v47 = vld [vmem:[#allocation2 + $0x70] sm:$0xff]  ;;  %v80_v48 = vld [vmem:[#allocation2 + $0x38] sm:$0xff] }
  0x56   :  { %1790 = vmatpush3.bf16.xpose.msk.msra.mxu1 %vm2212_vm1, %v1785_v12  ;;  %1769 = vmatprep.subr.msk.bf16.mxu0 %vm2212_vm1, %v1767_v19  ;;  %v89_v49 = vld [vmem:[#allocation2 + $0x80] sm:$0xff]  ;;  %v119_v50 = vld [vmem:[#allocation5 + $0xb0] sm:$0xff]  ;;  %v120_v51 = vld [vmem:[#allocation5 + $0xb8] sm:$0xff] }
  0x57   :  { %1793 = vmatprep.subr.msk.bf16.mxu1 %vm2212_vm1, %v1791_v20  ;;  %v88_v52 = vld [vmem:[#allocation2 + $0x78] sm:$0xff]  ;;  %v1821_v53 = vpack.c.bf16 %v120_v51, %v119_v50  ;;  %v90_v54 = vld [vmem:[#allocation2 + $0x88] sm:$0xff]  ;;  %v91_v55 = vld [vmem:[#allocation2 + $0x90] sm:$0xff] }
  0x58   :  { %v92_v56 = vld [vmem:[#allocation2 + $0x98] sm:$0xff]  ;;  %v93_v57 = vld [vmem:[#allocation2 + $0xa0] sm:$0xff]  ;;  %v94_v58 = vld [vmem:[#allocation2 + $0xa8] sm:$0xff] }
  0x59   :  { %v95_v59 = vld [vmem:[#allocation2 + $0xb0] sm:$0xff]  ;;  %v96_v60 = vld [vmem:[#allocation2 + $0xb8] sm:$0xff] }
  0x5d   :  { %1772 = vmatpush3.bf16.xpose.msk.msra.mxu0 %vm2212_vm1, %v1767_v19 }
  0x5e   :  { %1796 = vmatpush3.bf16.xpose.msk.msra.mxu1 %vm2212_vm1, %v1791_v20  ;;  %1775 = vmatprep.subr.msk.bf16.mxu0 %vm2212_vm1, %v1773_v25 }
  0x5f   :  { %1799 = vmatprep.subr.msk.bf16.mxu1 %vm2212_vm1, %v1797_v26 }
  0x65   :  { %1778 = vmatpush3.bf16.xpose.msk.msra.mxu0 %vm2212_vm1, %v1773_v25 }
  0x66   :  { %1802 = vmatpush3.bf16.xpose.msk.msra.mxu1 %vm2212_vm1, %v1797_v26  ;;  %1805 = vmatprep.subr.msk.bf16.mxu0 %vm2212_vm1, %v1803_v29 }
  0x6c   :  { %1604 = vmatmul.mubr.msk.f32.vlgmr.msra.gmra.mrb[0].mxu0 %vm145_vm0, %v74_v32 }
  0x6d   :  { %1632 = vmatmul.mubr.msk.f32.vlgmr.msra.gmra.mrb[0].mxu1 %vm145_vm0, %v82_v33  ;;  %1808 = vmatpush3.bf16.xpose.msk.msra.mxu0 %vm2212_vm1, %v1803_v29 }
  0x6e   :  { %1606 = vmatprep.mubr.msk.f32.mxu0 %vm145_vm0, %v75_v35  ;;  %1811 = vmatprep.subr.msk.bf16.mxu0 %vm2212_vm1, %v1809_v34 }
  0x6f   :  { %1634 = vmatprep.mubr.msk.f32.mxu1 %vm145_vm0, %v83_v36 }
  0x70   :  { %1607 = vmatmul.mubr.msk.f32.gmra.mrb[2].mxu0 %vm145_vm0, %v76_v37 }
  0x71   :  { %1609 = vmatprep.mubr.msk.f32.mxu0 %vm145_vm0, %v77_v38  ;;  %1635 = vmatmul.mubr.msk.f32.gmra.mrb[2].mxu1 %vm145_vm0, %v84_v39 }
  0x72   :  { %1637 = vmatprep.mubr.msk.f32.mxu1 %vm145_vm0, %v85_v42 }
  0x74   :  { %1610 = vmatmul.mubr.msk.f32.gmra.mrb[4].mxu0 %vm145_vm0, %v78_v43 }
  0x75   :  { %1814 = vmatpush3.bf16.xpose.msk.msra.mxu0 %vm2212_vm1, %v1809_v34  ;;  %1612 = vmatprep.mubr.msk.f32.mxu0 %vm145_vm0, %v79_v44 }
  0x76   :  { %1817 = vmatprep.subr.msk.bf16.mxu0 %vm2212_vm1, %v1815_v45  ;;  %1638 = vmatmul.mubr.msk.f32.gmra.mrb[4].mxu1 %vm145_vm0, %v86_v46 }
  0x77   :  { %1640 = vmatprep.mubr.msk.f32.mxu1 %vm145_vm0, %v87_v47 }
  0x78   :  { %1613 = vmatmul.mubr.msk.f32.gmra.mrb[6].mxu0 %vm145_vm0, %v80_v48 }
  0x79   :  { %1659 = vmatprep.mubr.msk.f32.mxu0 %vm145_vm0, %v89_v49 }
  0x7a   :  { %1641 = vmatmul.mubr.msk.f32.gmra.mrb[6].mxu1 %vm145_vm0, %v88_v52 }
  0x7d   :  { %1820 = vmatpush3.bf16.xpose.msk.msra.mxu0 %vm2212_vm1, %v1815_v45 }
  0x7e   :  { %1823 = vmatprep.subr.msk.bf16.mxu0 %vm2212_vm1, %v1821_v53 }
  0x85   :  { %1826 = vmatpush3.bf16.xpose.msk.msra.mxu0 %vm2212_vm1, %v1821_v53 }
  0x8c   :  { %1660 = vmatmul.mubr.msk.f32.vlgmr.msra.gmra.mrb[8].mxu0 %vm145_vm0, %v90_v54 }
  0x8d   :  { %1662 = vmatprep.mubr.msk.f32.mxu0 %vm145_vm0, %v91_v55 }
  0x90   :  { %1663 = vmatmul.mubr.msk.f32.gmra.mrb[10].mxu0 %vm145_vm0, %v92_v56 }
  0x91   :  { %1665 = vmatprep.mubr.msk.f32.mxu0 %vm145_vm0, %v93_v57 }
  0x94   :  { %1666 = vmatmul.mubr.msk.f32.gmra.mrb[12].mxu0 %vm145_vm0, %v94_v58 }
  0x95   :  { %1668 = vmatprep.mubr.msk.f32.mxu0 %vm145_vm0, %v95_v59 }
  0x98   :  { %1669 = vmatmul.mubr.msk.f32.gmra.mrb[14].mxu0 %vm145_vm0, %v96_v60 }
 0x13f   :  { %v1605_v61 = vpop.f32.mrb[0].mxu0 }
 0x140   :  { %v2288_v62 = vmul.f32 64.0, %v1605_v61  ;;  %v1633_v63 = vpop.f32.mrb[0].mxu1  ;;  %v260_v0 = vpop.f32.mrb[1].mxu0 }
 0x141   :  { %v2290_v1 = vmul.f32 64.0, %v1633_v63  ;;  %v413_v2 = vpop.f32.mrb[1].mxu1  ;;  %v2292_v3 = vmul.f32 64.0, %v260_v0 }
 0x142   :  { %v632_v4 = vsel %vm145_vm0, %v2288_v62, -inf  ;;  %v2300_v8 = vmul.f32 64.0, %v413_v2 }
 0x143   :  { %v656_v5 = vsel %vm145_vm0, %v2290_v1, -inf  ;;  %633 = vmax.xlane.f32.xlu0 %v632_v4  ;;  %v1608_v6 = vpop.f32.mrb[2].mxu0  ;;  %v629_v13 = vsel %vm145_vm0, %v2292_v3, -inf }
 0x144   :  { %657 = vmax.xlane.f32.xlu1 %v656_v5  ;;  %v2298_v7 = vmul.f32 64.0, %v1608_v6  ;;  %v270_v9 = vpop.f32.mrb[3].mxu0  ;;  %v1636_v10 = vpop.f32.mrb[2].mxu1  ;;  %v653_v16 = vsel %vm145_vm0, %v2300_v8, -inf }
 0x145   :  { %v2302_v11 = vmul.f32 64.0, %v270_v9  ;;  %v423_v12 = vpop.f32.mrb[3].mxu1  ;;  %v2328_v33 = vmul.f32 64.0, %v1636_v10 }
 0x146   :  { %v638_v14 = vsel %vm145_vm0, %v2298_v7, -inf  ;;  %v2324_v31 = vmul.f32 64.0, %v423_v12 }
 0x147   :  { %630 = vmax.xlane.f32.xlu0 %v629_v13  ;;  %v1611_v15 = vpop.f32.mrb[4].mxu0  ;;  %v635_v19 = vsel %vm145_vm0, %v2302_v11, -inf  ;;  %v662_v38 = vsel %vm145_vm0, %v2328_v33, -inf }
 0x148   :  { %639 = vmax.xlane.f32.xlu1 %v638_v14  ;;  %v280_v17 = vpop.f32.mrb[5].mxu0  ;;  %v2310_v18 = vmul.f32 64.0, %v1611_v15  ;;  %v659_v36 = vsel %vm145_vm0, %v2324_v31, -inf }
 0x149   :  { %v2314_v20 = vmul.f32 64.0, %v280_v17  ;;  %v1639_v21 = vpop.f32.mrb[4].mxu1 }
 0x14a   :  { %v433_v22 = vpop.f32.mrb[5].mxu1  ;;  %v644_v27 = vsel %vm145_vm0, %v2310_v18, -inf  ;;  %v2336_v37 = vmul.f32 64.0, %v1639_v21 }
 0x14b   :  { %654 = vmax.xlane.f32.xlu0 %v653_v16  ;;  %v1614_v23 = vpop.f32.mrb[6].mxu0  ;;  %v641_v24 = vsel %vm145_vm0, %v2314_v20, -inf  ;;  %v2332_v35 = vmul.f32 64.0, %v433_v22 }
 0x14c   :  { %636 = vmax.xlane.f32.xlu1 %v635_v19  ;;  %v290_v25 = vpop.f32.mrb[7].mxu0  ;;  %v2318_v26 = vmul.f32 64.0, %v1614_v23  ;;  %v668_v42 = vsel %vm145_vm0, %v2336_v37, -inf }
 0x14d   :  { %v2322_v28 = vmul.f32 64.0, %v290_v25  ;;  %v1642_v29 = vpop.f32.mrb[6].mxu1  ;;  %v665_v40 = vsel %vm145_vm0, %v2332_v35, -inf }
 0x14e   :  { %v443_v30 = vpop.f32.mrb[7].mxu1  ;;  %v650_v34 = vsel %vm145_vm0, %v2318_v26, -inf  ;;  %v2344_v41 = vmul.f32 64.0, %v1642_v29 }
 0x14f   :  { %642 = vmax.xlane.f32.xlu0 %v641_v24  ;;  %v647_v32 = vsel %vm145_vm0, %v2322_v28, -inf  ;;  %v2340_v39 = vmul.f32 64.0, %v443_v30 }
 0x150   :  { %645 = vmax.xlane.f32.xlu1 %v644_v27  ;;  %v674_v44 = vsel %vm145_vm0, %v2344_v41, -inf }
 0x151   :  { %v671_v43 = vsel %vm145_vm0, %v2340_v39, -inf }
 0x153   :  { %648 = vmax.xlane.f32.xlu0 %v647_v32 }
 0x154   :  { %651 = vmax.xlane.f32.xlu1 %v650_v34 }
 0x157   :  { %660 = vmax.xlane.f32.xlu0 %v659_v36 }
 0x158   :  { %663 = vmax.xlane.f32.xlu1 %v662_v38 }
 0x15b   :  { %666 = vmax.xlane.f32.xlu0 %v665_v40 }
 0x15c   :  { %669 = vmax.xlane.f32.xlu1 %v668_v42 }
 0x15f   :  { %672 = vmax.xlane.f32.xlu0 %v671_v43  ;;  %v1661_v45 = vpop.f32.mrb[8].mxu0 }
 0x160   :  { %675 = vmax.xlane.f32.xlu1 %v674_v44  ;;  %v2352_v46 = vmul.f32 64.0, %v1661_v45  ;;  %v566_v47 = vpop.f32.mrb[9].mxu0 }
 0x161   :  { %v2354_v48 = vmul.f32 64.0, %v566_v47 }
 0x162   :  { %v680_v49 = vsel %vm145_vm0, %v2352_v46, -inf }
 0x163   :  { %681 = vmax.xlane.f32.xlu0 %v680_v49  ;;  %v1664_v50 = vpop.f32.mrb[10].mxu0  ;;  %v677_v53 = vsel %vm145_vm0, %v2354_v48, -inf }
 0x164   :  { %v576_v51 = vpop.f32.mrb[11].mxu0  ;;  %v2364_v57 = vmul.f32 64.0, %v1664_v50 }
 0x165   :  { %v2358_v52 = vmul.f32 64.0, %v576_v51 }
 0x166   :  { %v686_v2 = vsel %vm145_vm0, %v2364_v57, -inf }
 0x167   :  { %678 = vmax.xlane.f32.xlu0 %v677_v53  ;;  %v1667_v54 = vpop.f32.mrb[12].mxu0  ;;  %v683_v59 = vsel %vm145_vm0, %v2358_v52, -inf }
 0x168   :  { %v2362_v55 = vmul.f32 64.0, %v1667_v54  ;;  %v586_v56 = vpop.f32.mrb[13].mxu0 }
 0x169   :  { %v2366_v58 = vmul.f32 64.0, %v586_v56 }
 0x16a   :  { %v692_v60 = vsel %vm145_vm0, %v2362_v55, -inf }
 0x16b   :  { %684 = vmax.xlane.f32.xlu0 %v683_v59  ;;  %693 = vmax.xlane.f32.xlu1 %v692_v60  ;;  %v1670_v61 = vpop.f32.mrb[14].mxu0  ;;  %v689_v4 = vsel %vm145_vm0, %v2366_v58, -inf }
 0x16c   :  { %v596_v63 = vpop.f32.mrb[15].mxu0  ;;  %v2380_v6 = vmul.f32 64.0, %v1670_v61 }
 0x16d   :  { %v2372_v0 = vmul.f32 64.0, %v596_v63 }
 0x16e   :  { %v698_v9 = vsel %vm145_vm0, %v2380_v6, -inf }
 0x16f   :  { %687 = vmax.xlane.f32.xlu0 %v686_v2  ;;  %690 = vmax.xlane.f32.xlu1 %v689_v4  ;;  %v695_v5 = vsel %vm145_vm0, %v2372_v0, -inf }
 0x173   :  { %696 = vmax.xlane.f32.xlu1 %v695_v5 }
 0x177   :  { %699 = vmax.xlane.f32.xlu1 %v698_v9 }
 0x1d0   :  { %v634_v10 = vpop.xlane.xlu0 %633 }
 0x1d1   :  { %v658_v12 = vpop.xlane.xlu1 %657  ;;  %v702_v13 = vsub.f32 %v2288_v62, %v634_v10 }
 0x1d2   :  { %v710_v14 = vsub.f32 %v2290_v1, %v658_v12 }
 0x1d3   :  { %v727_v15 = vmul.f32 1.442695, %v702_v13 }
 0x1d4   :  { %v743_v16 = vmul.f32 1.442695, %v710_v14  ;;  %v631_v17 = vpop.xlane.xlu0 %630 }
 0x1d5   :  { %1890 = vpow2.f32 %v727_v15  ;;  %v701_v19 = vsub.f32 %v2292_v3, %v631_v17  ;;  %v640_v21 = vpop.xlane.xlu1 %639 }
 0x1d6   :  { %v704_v22 = vsub.f32 %v2298_v7, %v640_v21  ;;  %1892 = vpow2.f32 %v743_v16 }
 0x1d7   :  { %v725_v23 = vmul.f32 1.442695, %v701_v19 }
 0x1d8   :  { %v731_v24 = vmul.f32 1.442695, %v704_v22  ;;  %v655_v25 = vpop.xlane.xlu0 %654 }
 0x1d9   :  { %1894 = vpow2.f32 %v725_v23  ;;  %v709_v27 = vsub.f32 %v2300_v8, %v655_v25  ;;  %v637_v29 = vpop.xlane.xlu1 %636 }
 0x1da   :  { %v703_v62 = vsub.f32 %v2302_v11, %v637_v29  ;;  %1896 = vpow2.f32 %v731_v24  ;;  %v122_v29 = vld [vmem:[#allocation7 + $0x8] sm:$0xff] }
 0x1db   :  { %v741_v1 = vmul.f32 1.442695, %v709_v27 }
 0x1dc   :  { %v729_v30 = vmul.f32 1.442695, %v703_v62  ;;  %v643_v32 = vpop.xlane.xlu0 %642 }
 0x1dd   :  { %1898 = vpow2.f32 %v741_v1  ;;  %v646_v34 = vpop.xlane.xlu1 %645  ;;  %v705_v3 = vsub.f32 %v2314_v20, %v643_v32 }
 0x1de   :  { %v706_v7 = vsub.f32 %v2310_v18, %v646_v34  ;;  %1900 = vpow2.f32 %v729_v30 }
 0x1df   :  { %v2392_v36 = vpop.eup %1890  ;;  %v733_v38 = vmul.f32 1.442695, %v705_v3 }
 0x1e0   :  { %v735_v40 = vmul.f32 1.442695, %v706_v7  ;;  %v649_v42 = vpop.xlane.xlu0 %648  ;;  %v776_v8 = vsel %vm145_vm0, %v2392_v36, 0.0  ;;  %v2396_v11 = vpop.eup %1892 }
 0x1e1   :  { %v652_v43 = vpop.xlane.xlu1 %651  ;;  %v707_v44 = vsub.f32 %v2322_v28, %v649_v42  ;;  %777 = vadd.xlane.f32.xlu1 %v776_v8  ;;  %v800_v51 = vsel %vm145_vm0, %v2396_v11, 0.0 }
 0x1e2   :  { %1902 = vpow2.f32 %v735_v40  ;;  %v708_v20 = vsub.f32 %v2318_v26, %v652_v43  ;;  %v124_v40 = vld [vmem:[#allocation7 + $0x18] sm:$0xff] }
 0x1e3   :  { %v2400_v45 = vpop.eup %1894  ;;  %1904 = vpow2.f32 %v733_v38  ;;  %v737_v18 = vmul.f32 1.442695, %v707_v44  ;;  %v123_v38 = vld [vmem:[#allocation7 + $0x10] sm:$0xff] }
 0x1e4   :  { %v739_v47 = vmul.f32 1.442695, %v708_v20  ;;  %v661_v49 = vpop.xlane.xlu0 %660  ;;  %v773_v50 = vsel %vm145_vm0, %v2400_v45, 0.0  ;;  %v2406_v53 = vpop.eup %1896  ;;  %v1831_v8 = vpack.c.bf16 %v124_v40, %v123_v38 }
 0x1e5   :  { %v664_v54 = vpop.xlane.xlu1 %663  ;;  %v711_v28 = vsub.f32 %v2324_v31, %v661_v49  ;;  %774 = vadd.xlane.f32.xlu0 %v773_v50  ;;  %801 = vadd.xlane.f32.xlu1 %v800_v51  ;;  %v782_v2 = vsel %vm145_vm0, %v2406_v53, 0.0  ;;  %v125_v51 = vld [vmem:[#allocation7 + $0x20] sm:$0xff] }
 0x1e6   :  { %1906 = vpow2.f32 %v739_v47  ;;  %v712_v26 = vsub.f32 %v2328_v33, %v664_v54  ;;  %v126_v54 = vld [vmem:[#allocation7 + $0x28] sm:$0xff] }
 0x1e7   :  { %v2410_v56 = vpop.eup %1898  ;;  %1908 = vpow2.f32 %v737_v18  ;;  %v745_v59 = vmul.f32 1.442695, %v711_v28 }
 0x1e8   :  { %v747_v60 = vmul.f32 1.442695, %v712_v26  ;;  %v667_v61 = vpop.xlane.xlu0 %666  ;;  %v797_v63 = vsel %vm145_vm0, %v2410_v56, 0.0  ;;  %v2416_v4 = vpop.eup %1900 }
 0x1e9   :  { %v670_v31 = vpop.xlane.xlu1 %669  ;;  %v713_v5 = vsub.f32 %v2332_v35, %v667_v61  ;;  %798 = vadd.xlane.f32.xlu0 %v797_v63  ;;  %783 = vadd.xlane.f32.xlu1 %v782_v2  ;;  %v779_v14 = vsel %vm145_vm0, %v2416_v4, 0.0 }
 0x1ea   :  { %1910 = vpow2.f32 %v747_v60  ;;  %v714_v33 = vsub.f32 %v2336_v37, %v670_v31 }
 0x1eb   :  { %1912 = vpow2.f32 %v745_v59  ;;  %v749_v9 = vmul.f32 1.442695, %v713_v5  ;;  %v1835_v59 = vpack.c.bf16 %v126_v54, %v125_v51  ;;  %v141_v51 = vld [vmem:[#allocation7 + $0xa0] sm:$0xff]  ;;  %v142_v54 = vld [vmem:[#allocation7 + $0xa8] sm:$0xff] }
 0x1ec   :  { %v2420_v10 = vpop.eup %1902  ;;  %v751_v12 = vmul.f32 1.442695, %v714_v33  ;;  %v673_v13 = vpop.xlane.xlu0 %672  ;;  %v127_v33 = vld [vmem:[#allocation7 + $0x30] sm:$0xff] }
 0x1ed   :  { %v2424_v15 = vpop.eup %1904  ;;  %v676_v16 = vpop.xlane.xlu1 %675  ;;  %v715_v17 = vsub.f32 %v2340_v39, %v673_v13  ;;  %780 = vadd.xlane.f32.xlu0 %v779_v14  ;;  %v788_v35 = vsel %vm145_vm0, %v2420_v10, 0.0 }
 0x1ee   :  { %1914 = vpow2.f32 %v751_v12  ;;  %v716_v37 = vsub.f32 %v2344_v41, %v676_v16  ;;  %789 = vadd.xlane.f32.xlu1 %v788_v35  ;;  %v785_v24 = vsel %vm145_vm0, %v2424_v15, 0.0  ;;  %v121_v41 = vld [vmem:[#allocation7] sm:$0xff] }
 0x1ef   :  { %1916 = vpow2.f32 %v749_v9  ;;  %v753_v19 = vmul.f32 1.442695, %v715_v17  ;;  %v1827_v1 = vpack.c.bf16 %v122_v29, %v121_v41  ;;  %v128_v9 = vld [vmem:[#allocation7 + $0x38] sm:$0xff] }
 0x1f0   :  { %v2430_v21 = vpop.eup %1906  ;;  %v755_v22 = vmul.f32 1.442695, %v716_v37  ;;  %v682_v23 = vpop.xlane.xlu0 %681  ;;  %v1839_v14 = vpack.c.bf16 %v128_v9, %v127_v33 }
 0x1f1   :  { %v2434_v25 = vpop.eup %1908  ;;  %v718_v39 = vsub.f32 %v2352_v46, %v682_v23  ;;  %786 = vadd.xlane.f32.xlu0 %v785_v24  ;;  %v794_v27 = vsel %vm145_vm0, %v2430_v21, 0.0  ;;  %1828 = vmatprep.subr.bf16.mxu1 %v1827_v1  ;;  %v129_v24 = vld [vmem:[#allocation7 + $0x40] sm:$0xff] }
 0x1f2   :  { %1918 = vpow2.f32 %v755_v22  ;;  %795 = vadd.xlane.f32.xlu1 %v794_v27  ;;  %v791_v34 = vsel %vm145_vm0, %v2434_v25, 0.0  ;;  %1830 = vmatpush3.bf16.msra.mxu1 %v1827_v1 }
 0x1f3   :  { %1920 = vpow2.f32 %v753_v19  ;;  %v759_v62 = vmul.f32 1.442695, %v718_v39  ;;  %1832 = vmatprep.subr.bf16.mxu1 %v1831_v8  ;;  %v130_v39 = vld [vmem:[#allocation7 + $0x48] sm:$0xff] }
 0x1f4   :  { %v2439_v30 = vpop.eup %1910  ;;  %v679_v32 = vpop.xlane.xlu0 %678 }
 0x1f5   :  { %v2443_v3 = vpop.eup %1912  ;;  %v717_v46 = vsub.f32 %v2354_v48, %v679_v32  ;;  %792 = vadd.xlane.f32.xlu0 %v791_v34  ;;  %v806_v7 = vsel %vm145_vm0, %v2439_v30, 0.0  ;;  %1922 = vpow2.f32 %v759_v62 }
 0x1f6   :  { %807 = vadd.xlane.f32.xlu1 %v806_v7  ;;  %v803_v18 = vsel %vm145_vm0, %v2443_v3, 0.0  ;;  %1834 = vmatpush3.bf16.msra.mxu1 %v1831_v8 }
 0x1f7   :  { %v757_v42 = vmul.f32 1.442695, %v717_v46  ;;  %1836 = vmatprep.subr.bf16.mxu1 %v1835_v59 }
 0x1f8   :  { %v2448_v43 = vpop.eup %1914  ;;  %v685_v44 = vpop.xlane.xlu0 %684 }
 0x1f9   :  { %v694_v20 = vpop.xlane.xlu1 %693  ;;  %v2452_v48 = vpop.eup %1916  ;;  %v719_v47 = vsub.f32 %v2358_v52, %v685_v44  ;;  %804 = vadd.xlane.f32.xlu0 %v803_v18  ;;  %v812_v50 = vsel %vm145_vm0, %v2448_v43, 0.0  ;;  %1924 = vpow2.f32 %v757_v42  ;;  %v137_v44 = vld [vmem:[#allocation7 + $0x80] sm:$0xff] }
 0x1fa   :  { %v722_v49 = vsub.f32 %v2362_v55, %v694_v20  ;;  %813 = vadd.xlane.f32.xlu1 %v812_v50  ;;  %v809_v52 = vsel %vm145_vm0, %v2452_v48, 0.0  ;;  %1838 = vmatpush3.bf16.msra.mxu1 %v1835_v59  ;;  %v138_v20 = vld [vmem:[#allocation7 + $0x88] sm:$0xff]  ;;  %v144_v59 = vld [vmem:[#allocation7 + $0xb8] sm:$0xff] }
 0x1fb   :  { %v761_v28 = vmul.f32 1.442695, %v719_v47  ;;  %1840 = vmatprep.subr.bf16.mxu1 %v1839_v14  ;;  %v2507_v18 = vpack.c.bf16 %v138_v20, %v137_v44  ;;  %v139_v47 = vld [vmem:[#allocation7 + $0x90] sm:$0xff] }
 0x1fc   :  { %v767_v26 = vmul.f32 1.442695, %v722_v49  ;;  %v2458_v60 = vpop.eup %1918  ;;  %v688_v61 = vpop.xlane.xlu0 %687  ;;  %v140_v49 = vld [vmem:[#allocation7 + $0x98] sm:$0xff]  ;;  %v895_v44 = vld [vmem:[#allocation8 + $0x10] sm:$0xff] }
 0x1fd   :  { %v691_v63 = vpop.xlane.xlu1 %690  ;;  %v2462_v55 = vpop.eup %1920  ;;  %v720_v2 = vsub.f32 %v2364_v57, %v688_v61  ;;  %810 = vadd.xlane.f32.xlu0 %v809_v52  ;;  %v818_v5 = vsel %vm145_vm0, %v2458_v60, 0.0  ;;  %1860 = vmatprep.subr.bf16.mxu0 %v2507_v18  ;;  %v2511_v50 = vpack.c.bf16 %v140_v49, %v139_v47  ;;  %vm919_vm4 = vcmp.ge.f32.partialorder %v895_v44, 0.1 }
 0x1fe   :  { %v721_v31 = vsub.f32 %v2366_v58, %v691_v63  ;;  %1926 = vpow2.f32 %v767_v26  ;;  %819 = vadd.xlane.f32.xlu1 %v818_v5  ;;  %v815_v57 = vsel %vm145_vm0, %v2462_v55, 0.0  ;;  %1842 = vmatpush3.bf16.msra.mxu1 %v1839_v14  ;;  %v143_v26 = vld [vmem:[#allocation7 + $0xb0] sm:$0xff]  ;;  %v893_v14 = vld [vmem:[#allocation8] sm:$0xff] }
 0x1ff   :  { %1928 = vpow2.f32 %v761_v28  ;;  %v763_v12 = vmul.f32 1.442695, %v720_v2  ;;  %v2470_v17 = vpop.eup %1922  ;;  %1862 = vmatpush3.bf16.msra.mxu0 %v2507_v18  ;;  %v2515_v28 = vpack.c.bf16 %v142_v54, %v141_v51  ;;  %v2519_v61 = vpack.c.bf16 %v144_v59, %v143_v26  ;;  %v897_v54 = vld [vmem:[#allocation8 + $0x20] sm:$0xff] }
 0x200   :  { %v765_v13 = vmul.f32 1.442695, %v721_v31  ;;  %v824_v19 = vsel %vm145_vm0, %v2470_v17, 0.0  ;;  %1864 = vmatprep.subr.bf16.mxu0 %v2511_v50  ;;  %vm917_vm2 = vcmp.ge.f32.partialorder %v893_v14, 0.1 }
 0x201   :  { %v697_v16 = vpop.xlane.xlu1 %696  ;;  %816 = vadd.xlane.f32.xlu0 %v815_v57  ;;  %v894_v57 = vld [vmem:[#allocation8 + $0x8] sm:$0xff]  ;;  %vm921_vm6 = vcmp.ge.f32.partialorder %v897_v54, 0.1 }
 0x202   :  { %v723_v58 = vsub.f32 %v2372_v0, %v697_v16  ;;  %1930 = vpow2.f32 %v765_v13  ;;  %v2478_v0 = vpack.c.bf16 %v130_v39, %v129_v24  ;;  %v132_v24 = vld [vmem:[#allocation7 + $0x58] sm:$0xff]  ;;  %vm918_vm3 = vcmp.ge.f32.partialorder %v894_v57, 0.1 }
 0x203   :  { %1932 = vpow2.f32 %v763_v12  ;;  %v2475_v22 = vpop.eup %1924  ;;  %1866 = vmatpush3.bf16.msra.mxu0 %v2511_v50 }
 0x204   :  { %v769_v35 = vmul.f32 1.442695, %v723_v58  ;;  %v821_v29 = vsel %vm145_vm0, %v2475_v22, 0.0  ;;  %1844 = vmatprep.subr.bf16.mxu1 %v2478_v0  ;;  %1868 = vmatprep.subr.bf16.mxu0 %v2515_v28 }
 0x205   :  { %v700_v37 = vpop.xlane.xlu1 %699  ;;  %825 = vadd.xlane.f32.xlu0 %v824_v19 }
 0x206   :  { %1934 = vpow2.f32 %v769_v35  ;;  %v724_v23 = vsub.f32 %v2380_v6, %v700_v37 }
 0x207   :  { %1870 = vmatpush3.bf16.msra.mxu0 %v2515_v28 }
 0x208   :  { %v771_v27 = vmul.f32 1.442695, %v724_v23  ;;  %v2480_v41 = vpop.eup %1926  ;;  %1872 = vmatprep.subr.bf16.mxu0 %v2519_v61  ;;  %v131_v23 = vld [vmem:[#allocation7 + $0x50] sm:$0xff] }
 0x209   :  { %v2484_v62 = vpop.eup %1928  ;;  %822 = vadd.xlane.f32.xlu0 %v821_v29  ;;  %v836_v1 = vsel %vm145_vm0, %v2480_v41, 0.0 }
 0x20a   :  { %1936 = vpow2.f32 %v771_v27  ;;  %837 = vadd.xlane.f32.xlu1 %v836_v1  ;;  %v827_v32 = vsel %vm145_vm0, %v2484_v62, 0.0 }
 0x20b   :  { %1874 = vmatpush3.bf16.msra.mxu0 %v2519_v61 }
 0x20c   :  { %v2489_v6 = vpop.eup %1930 }
 0x20d   :  { %v2493_v34 = vpop.eup %1932  ;;  %828 = vadd.xlane.f32.xlu0 %v827_v32  ;;  %v833_v46 = vsel %vm145_vm0, %v2489_v6, 0.0  ;;  %v1847_v32 = vpack.c.bf16 %v132_v24, %v131_v23 }
 0x20e   :  { %834 = vadd.xlane.f32.xlu1 %v833_v46  ;;  %v830_v38 = vsel %vm145_vm0, %v2493_v34, 0.0 }
 0x210   :  { %v2497_v7 = vpop.eup %1934 }
 0x211   :  { %v839_v40 = vsel %vm145_vm0, %v2497_v7, 0.0  ;;  %831 = vadd.xlane.f32.xlu0 %v830_v38 }
 0x212   :  { %840 = vadd.xlane.f32.xlu1 %v839_v40 }
 0x214   :  { %v2503_v42 = vpop.eup %1936 }
 0x215   :  { %v842_v8 = vsel %vm145_vm0, %v2503_v42, 0.0 }
 0x216   :  { %843 = vadd.xlane.f32.xlu1 %v842_v8  ;;  %v134_v8 = vld [vmem:[#allocation7 + $0x68] sm:$0xff] }
 0x26e   :  { %v778_v63 = vpop.xlane.xlu1 %777 }
 0x26f   :  { %1938 = vrcp.f32 %v778_v63 }
 0x272   :  { %v775_v52 = vpop.xlane.xlu0 %774  ;;  %v802_v2 = vpop.xlane.xlu1 %801 }
 0x273   :  { %1940 = vrcp.f32 %v775_v52 }
 0x276   :  { %v799_v31 = vpop.xlane.xlu0 %798  ;;  %v784_v5 = vpop.xlane.xlu1 %783 }
 0x277   :  { %1942 = vrcp.f32 %v784_v5 }
 0x279   :  { %v1939_v33 = vpop.eup %1938 }
 0x27a   :  { %v781_v9 = vpop.xlane.xlu0 %780  ;;  %v848_v12 = vmul.f32 1.1111112, %v1939_v33 }
 0x27b   :  { %1944 = vrcp.f32 %v781_v9  ;;  %v790_v13 = vpop.xlane.xlu1 %789  ;;  %v898_v9 = vld [vmem:[#allocation8 + $0x28] sm:$0xff] }
 0x27c   :  { %1946 = vrcp.f32 %v790_v13  ;;  %v942_v37 = vmul.f32 %v2392_v36, %v848_v12  ;;  %v133_v36 = vld [vmem:[#allocation7 + $0x60] sm:$0xff]  ;;  %vm922_vm7 = vcmp.ge.f32.partialorder %v898_v9, 0.1 }
 0x27d   :  { %v1941_v16 = vpop.eup %1940  ;;  %1948 = vrcp.f32 %v799_v31  ;;  %v1851_v26 = vpack.c.bf16 %v134_v8, %v133_v36  ;;  %v136_v31 = vld [vmem:[#allocation7 + $0x78] sm:$0xff] }
 0x27e   :  { %v846_v58 = vmul.f32 1.1111112, %v1941_v16  ;;  %v787_v35 = vpop.xlane.xlu0 %786  ;;  %v966_v46 = vsel %vm918_vm3, %v942_v37, 0.0  ;;  %v899_v37 = vld [vmem:[#allocation8 + $0x30] sm:$0xff] }
 0x27f   :  { %1950 = vrcp.f32 %v787_v35  ;;  %v796_v19 = vpop.xlane.xlu1 %795  ;;  %vm923_vm8 = vcmp.ge.f32.partialorder %v899_v37, 0.1 }
 0x280   :  { %v941_v39 = vmul.f32 %v2400_v45, %v846_v58  ;;  %1952 = vrcp.f32 %v796_v19  ;;  %v896_v45 = vld [vmem:[#allocation8 + $0x18] sm:$0xff] }
 0x281   :  { %v1943_v27 = vpop.eup %1942  ;;  %1954 = vrcp.f32 %v802_v2  ;;  %v135_v2 = vld [vmem:[#allocation7 + $0x70] sm:$0xff]  ;;  %vm920_vm5 = vcmp.ge.f32.partialorder %v896_v45, 0.1 }
 0x282   :  { %v793_v29 = vpop.xlane.xlu0 %792  ;;  %v965_v1 = vsel %vm917_vm2, %v941_v39, 0.0  ;;  %v852_v38 = vmul.f32 1.1111112, %v1943_v27  ;;  %v900_v27 = vld [vmem:[#allocation8 + $0x38] sm:$0xff] }
 0x283   :  { %1956 = vrcp.f32 %v793_v29  ;;  %v808_v40 = vpop.xlane.xlu1 %807  ;;  %1687 = vmatprep.mubr.msk.f32.mxu1 %vm145_vm0, %v965_v1  ;;  %vm924_vm9 = vcmp.ge.f32.partialorder %v900_v27, 0.1 }
 0x284   :  { %1688 = vmatmul.mubr.msk.f32.vlgmr.msra.gmra.mrb[8].mxu1 %vm145_vm0, %v966_v46  ;;  %1958 = vrcp.f32 %v808_v40  ;;  %v944_v59 = vmul.f32 %v2406_v53, %v852_v38  ;;  %v1855_v53 = vpack.c.bf16 %v136_v31, %v135_v2 }
 0x285   :  { %v1945_v20 = vpop.eup %1944  ;;  %1846 = vmatpush3.bf16.msra.mxu1 %v2478_v0 }
 0x286   :  { %v1947_v47 = vpop.eup %1946  ;;  %v850_v49 = vmul.f32 1.1111112, %v1945_v20  ;;  %v805_v51 = vpop.xlane.xlu0 %804  ;;  %1848 = vmatprep.subr.bf16.mxu1 %v1847_v32  ;;  %v902_v20 = vld [vmem:[#allocation8 + $0x48] sm:$0xff] }
 0x287   :  { %v856_v63 = vmul.f32 1.1111112, %v1947_v47  ;;  %1960 = vrcp.f32 %v805_v51  ;;  %v814_v52 = vpop.xlane.xlu1 %813  ;;  %v1949_v5 = vpop.eup %1948  ;;  %vm926_vm11 = vcmp.ge.f32.partialorder %v902_v20, 0.1 }
 0x288   :  { %v943_v33 = vmul.f32 %v2416_v4, %v850_v49  ;;  %1962 = vrcp.f32 %v814_v52  ;;  %v968_v4 = vsel %vm920_vm5, %v944_v59, 0.0  ;;  %v862_v23 = vmul.f32 1.1111112, %v1949_v5  ;;  %v903_v49 = vld [vmem:[#allocation8 + $0x50] sm:$0xff]  ;;  %v904_v52 = vld [vmem:[#allocation8 + $0x58] sm:$0xff] }
 0x289   :  { %v1951_v0 = vpop.eup %1950  ;;  %1850 = vmatpush3.bf16.msra.mxu1 %v1847_v32  ;;  %v946_v57 = vmul.f32 %v2420_v10, %v856_v63  ;;  %v901_v32 = vld [vmem:[#allocation8 + $0x40] sm:$0xff]  ;;  %vm927_vm12 = vcmp.ge.f32.partialorder %v903_v49, 0.1  ;;  %vm928_vm13 = vcmp.ge.f32.partialorder %v904_v52, 0.1 }
 0x28a   :  { %v1953_v12 = vpop.eup %1952  ;;  %v854_v13 = vmul.f32 1.1111112, %v1951_v0  ;;  %v811_v14 = vpop.xlane.xlu0 %810  ;;  %v967_v16 = vsel %vm919_vm4, %v943_v33, 0.0  ;;  %1852 = vmatprep.subr.bf16.mxu1 %v1851_v26  ;;  %v949_v36 = vmul.f32 %v2410_v56, %v862_v23  ;;  %vm925_vm10 = vcmp.ge.f32.partialorder %v901_v32, 0.1  ;;  %v908_v23 = vld [vmem:[#allocation8 + $0x78] sm:$0xff] }
 0x28b   :  { %v860_v58 = vmul.f32 1.1111112, %v1953_v12  ;;  %1964 = vrcp.f32 %v811_v14  ;;  %v820_v35 = vpop.xlane.xlu1 %819  ;;  %1690 = vmatprep.mubr.msk.f32.mxu1 %vm145_vm0, %v967_v16  ;;  %v1955_v19 = vpop.eup %1954  ;;  %v906_v16 = vld [vmem:[#allocation8 + $0x68] sm:$0xff]  ;;  %vm932_vm2 = vcmp.ge.f32.partialorder %v908_v23, 0.1 }
 0x28c   :  { %v945_v24 = vmul.f32 %v2424_v15, %v854_v13  ;;  %1691 = vmatmul.mubr.msk.f32.gmra.mrb[10].mxu1 %vm145_vm0, %v968_v4  ;;  %1966 = vrcp.f32 %v820_v35  ;;  %v864_v46 = vmul.f32 1.1111112, %v1955_v19  ;;  %v970_v15 = vsel %vm922_vm7, %v946_v57, 0.0  ;;  %v907_v57 = vld [vmem:[#allocation8 + $0x70] sm:$0xff]  ;;  %v910_v32 = vld [vmem:[#allocation8 + $0x88] sm:$0xff] }
 0x28d   :  { %v1957_v39 = vpop.eup %1956  ;;  %1854 = vmatpush3.bf16.msra.mxu1 %v1851_v26  ;;  %v948_v38 = vmul.f32 %v2430_v21, %v860_v58  ;;  %v973_v59 = vsel %vm925_vm10, %v949_v36, 0.0  ;;  %vm930_vm15 = vcmp.ge.f32.partialorder %v906_v16, 0.1  ;;  %vm931_vm1 = vcmp.ge.f32.partialorder %v907_v57, 0.1 }
 0x28e   :  { %v858_v29 = vmul.f32 1.1111112, %v1957_v39  ;;  %v817_v10 = vpop.xlane.xlu0 %816  ;;  %v969_v1 = vsel %vm921_vm6, %v945_v24, 0.0  ;;  %1856 = vmatprep.subr.bf16.mxu1 %v1855_v53  ;;  %v1959_v40 = vpop.eup %1958  ;;  %v950_v51 = vmul.f32 %v2396_v11, %v864_v46  ;;  %v905_v11 = vld [vmem:[#allocation8 + $0x60] sm:$0xff]  ;;  %vm934_vm4 = vcmp.ge.f32.partialorder %v910_v32, 0.1 }
 0x28f   :  { %1968 = vrcp.f32 %v817_v10  ;;  %1693 = vmatprep.mubr.msk.f32.mxu1 %vm145_vm0, %v969_v1  ;;  %v868_v54 = vmul.f32 1.1111112, %v1959_v40  ;;  %v972_v56 = vsel %vm924_vm9, %v948_v38, 0.0  ;;  %vm929_vm14 = vcmp.ge.f32.partialorder %v905_v11, 0.1  ;;  %v909_v10 = vld [vmem:[#allocation8 + $0x80] sm:$0xff] }
 0x290   :  { %v947_v8 = vmul.f32 %v2434_v25, %v858_v29  ;;  %1694 = vmatmul.mubr.msk.f32.gmra.mrb[12].mxu1 %vm145_vm0, %v970_v15  ;;  %v974_v5 = vsel %vm926_vm11, %v950_v51, 0.0  ;;  %vm933_vm3 = vcmp.ge.f32.partialorder %v909_v10, 0.1 }
 0x291   :  { %v1961_v44 = vpop.eup %1960  ;;  %1858 = vmatpush3.bf16.msra.mxu1 %v1855_v53  ;;  %v952_v33 = vmul.f32 %v2439_v30, %v868_v54  ;;  %v912_v54 = vld [vmem:[#allocation8 + $0x98] sm:$0xff] }
 0x292   :  { %v866_v45 = vmul.f32 1.1111112, %v1961_v44  ;;  %v826_v47 = vpop.xlane.xlu0 %825  ;;  %v971_v21 = vsel %vm923_vm8, %v947_v8, 0.0  ;;  %1875 = vmatprep.subr.bf16.mxu1 %v2507_v18  ;;  %v1963_v25 = vpop.eup %1962  ;;  %v911_v8 = vld [vmem:[#allocation8 + $0x90] sm:$0xff]  ;;  %vm936_vm8 = vcmp.ge.f32.partialorder %v912_v54, 0.1 }
 0x293   :  { %1970 = vrcp.f32 %v826_v47  ;;  %1696 = vmatprep.mubr.msk.f32.mxu1 %vm145_vm0, %v971_v21  ;;  %v872_v0 = vmul.f32 1.1111112, %v1963_v25  ;;  %v976_v4 = vsel %vm928_vm13, %v952_v33, 0.0  ;;  %vm935_vm5 = vcmp.ge.f32.partialorder %v911_v8, 0.1  ;;  %v915_v25 = vld [vmem:[#allocation8 + $0xb0] sm:$0xff] }
 0x294   :  { %v951_v26 = vmul.f32 %v2443_v3, %v866_v45  ;;  %1697 = vmatmul.mubr.msk.f32.gmra.mrb[14].mxu1 %vm145_vm0, %v972_v56  ;;  %v914_v45 = vld [vmem:[#allocation8 + $0xa8] sm:$0xff]  ;;  %vm939_vm9 = vcmp.ge.f32.partialorder %v915_v25, 0.1 }
 0x295   :  { %v1965_v63 = vpop.eup %1964  ;;  %1715 = vmatprep.mubr.msk.f32.mxu1 %vm145_vm0, %v973_v59  ;;  %v954_v58 = vmul.f32 %v2448_v43, %v872_v0  ;;  %vm938_vm7 = vcmp.ge.f32.partialorder %v914_v45, 0.1 }
 0x296   :  { %v870_v2 = vmul.f32 1.1111112, %v1965_v63  ;;  %v823_v31 = vpop.xlane.xlu0 %822  ;;  %v1967_v12 = vpop.eup %1966  ;;  %v975_v13 = vsel %vm927_vm12, %v951_v26, 0.0 }
 0x297   :  { %1972 = vrcp.f32 %v823_v31  ;;  %v838_v9 = vpop.xlane.xlu1 %837  ;;  %v978_v27 = vsel %vm930_vm15, %v954_v58, 0.0 }
 0x298   :  { %v953_v3 = vmul.f32 %v2452_v48, %v870_v2  ;;  %1974 = vrcp.f32 %v838_v9  ;;  %1716 = vmatmul.mubr.msk.f32.vlgmr.msra.gmra.mrb[16].mxu1 %vm145_vm0, %v974_v5  ;;  %v876_v48 = vmul.f32 1.1111112, %v1967_v12 }
 0x299   :  { %v1969_v14 = vpop.eup %1968  ;;  %1718 = vmatprep.mubr.msk.f32.mxu1 %vm145_vm0, %v975_v13  ;;  %1879 = vmatpush3.bf16.msra.mxu1 %v2507_v18 }
 0x29a   :  { %v874_v53 = vmul.f32 1.1111112, %v1969_v14  ;;  %v829_v30 = vpop.xlane.xlu0 %828  ;;  %1876 = vmatprep.subr.bf16.mxu1 %v2511_v50  ;;  %v977_v19 = vsel %vm929_vm14, %v953_v3, 0.0  ;;  %v956_v43 = vmul.f32 %v2458_v60, %v876_v48 }
 0x29b   :  { %1976 = vrcp.f32 %v829_v30  ;;  %v835_v35 = vpop.xlane.xlu1 %834 }
 0x29c   :  { %v955_v37 = vmul.f32 %v2462_v55, %v874_v53  ;;  %1978 = vrcp.f32 %v835_v35  ;;  %1719 = vmatmul.mubr.msk.f32.gmra.mrb[18].mxu1 %vm145_vm0, %v976_v4  ;;  %v980_v15 = vsel %vm932_vm2, %v956_v43, 0.0 }
 0x29d   :  { %v1971_v18 = vpop.eup %1970  ;;  %1721 = vmatprep.mubr.msk.f32.mxu1 %vm145_vm0, %v977_v19  ;;  %1880 = vmatpush3.bf16.msra.mxu1 %v2511_v50 }
 0x29e   :  { %v832_v24 = vpop.xlane.xlu0 %831  ;;  %1877 = vmatprep.subr.bf16.mxu1 %v2515_v28  ;;  %v880_v39 = vmul.f32 1.1111112, %v1971_v18  ;;  %v979_v29 = vsel %vm931_vm1, %v955_v37, 0.0 }
 0x29f   :  { %1980 = vrcp.f32 %v832_v24  ;;  %v841_v55 = vpop.xlane.xlu1 %840 }
 0x2a0   :  { %1982 = vrcp.f32 %v841_v55  ;;  %1722 = vmatmul.mubr.msk.f32.gmra.mrb[20].mxu1 %vm145_vm0, %v978_v27  ;;  %v958_v60 = vmul.f32 %v2470_v17, %v880_v39 }
 0x2a1   :  { %v1973_v1 = vpop.eup %1972  ;;  %1724 = vmatprep.mubr.msk.f32.mxu1 %vm145_vm0, %v979_v29  ;;  %1881 = vmatpush3.bf16.msra.mxu1 %v2515_v28  ;;  %v913_v28 = vld [vmem:[#allocation8 + $0xa0] sm:$0xff] }
 0x2a2   :  { %v1975_v50 = vpop.eup %1974  ;;  %v878_v46 = vmul.f32 1.1111112, %v1973_v1  ;;  %1878 = vmatprep.subr.bf16.mxu1 %v2519_v61  ;;  %v982_v17 = vsel %vm934_vm4, %v958_v60, 0.0  ;;  %vm937_vm6 = vcmp.ge.f32.partialorder %v913_v28, 0.1 }
 0x2a3   :  { %v844_v38 = vpop.xlane.xlu1 %843  ;;  %v888_v36 = vmul.f32 1.1111112, %v1975_v50 }
 0x2a4   :  { %v957_v40 = vmul.f32 %v2475_v22, %v878_v46  ;;  %1984 = vrcp.f32 %v844_v38  ;;  %1725 = vmatmul.mubr.msk.f32.gmra.mrb[22].mxu1 %vm145_vm0, %v980_v15 }
 0x2a5   :  { %v1977_v44 = vpop.eup %1976  ;;  %1882 = vmatpush3.bf16.msra.mxu1 %v2519_v61  ;;  %v962_v22 = vmul.f32 %v2480_v41, %v888_v36 }
 0x2a6   :  { %v1979_v20 = vpop.eup %1978  ;;  %v882_v47 = vmul.f32 1.1111112, %v1977_v44  ;;  %v981_v21 = vsel %vm933_vm3, %v957_v40, 0.0 }
 0x2a7   :  { %v886_v49 = vmul.f32 1.1111112, %v1979_v20  ;;  %1743 = vmatprep.mubr.msk.f32.mxu0 %vm145_vm0, %v981_v21  ;;  %v986_v41 = vsel %vm938_vm7, %v962_v22, 0.0 }
 0x2a8   :  { %v959_v51 = vmul.f32 %v2484_v62, %v882_v47  ;;  %1744 = vmatmul.mubr.msk.f32.vlgmr.msra.gmra.mrb[16].mxu0 %vm145_vm0, %v982_v17 }
 0x2a9   :  { %v1981_v56 = vpop.eup %1980  ;;  %v961_v61 = vmul.f32 %v2489_v6, %v886_v49  ;;  %v916_v6 = vld [vmem:[#allocation8 + $0xb8] sm:$0xff] }
 0x2aa   :  { %v1983_v26 = vpop.eup %1982  ;;  %v884_v59 = vmul.f32 1.1111112, %v1981_v56  ;;  %v983_v63 = vsel %vm935_vm5, %v959_v51, 0.0  ;;  %vm940_vm10 = vcmp.ge.f32.partialorder %v916_v6, 0.1 }
 0x2ab   :  { %v890_v52 = vmul.f32 1.1111112, %v1983_v26  ;;  %1746 = vmatprep.mubr.msk.f32.mxu0 %vm145_vm0, %v983_v63  ;;  %v985_v2 = vsel %vm937_vm6, %v961_v61, 0.0 }
 0x2ac   :  { %v960_v62 = vmul.f32 %v2493_v34, %v884_v59  ;;  %1749 = vmatprep.mubr.msk.f32.mxu1 %vm145_vm0, %v985_v2 }
 0x2ad   :  { %v963_v31 = vmul.f32 %v2497_v7, %v890_v52  ;;  %1750 = vmatmul.mubr.msk.f32.vlgmr.msra.gmra.mrb[24].mxu1 %vm145_vm0, %v986_v41 }
 0x2ae   :  { %v1985_v11 = vpop.eup %1984  ;;  %v984_v5 = vsel %vm936_vm8, %v960_v62, 0.0 }
 0x2af   :  { %v892_v33 = vmul.f32 1.1111112, %v1985_v11  ;;  %1747 = vmatmul.mubr.msk.f32.gmra.mrb[18].mxu0 %vm145_vm0, %v984_v5  ;;  %v987_v0 = vsel %vm939_vm9, %v963_v31, 0.0 }
 0x2b0   :  { %1752 = vmatprep.mubr.msk.f32.mxu1 %vm145_vm0, %v987_v0 }
 0x2b1   :  { %v964_v9 = vmul.f32 %v2503_v42, %v892_v33 }
 0x2b3   :  { %v988_v34 = vsel %vm940_vm10, %v964_v9, 0.0 }
 0x2b4   :  { %1753 = vmatmul.mubr.msk.f32.gmra.mrb[26].mxu1 %vm145_vm0, %v988_v34 }
 0x357   :  { %v1689_v12 = vpop.f32.mrb[8].mxu1 }
 0x358   :  { %1377 = vst.msk [vmem:[#allocation10 + $0x8] sm:$0xff] %vm145_vm0, %v1689_v12  ;;  %v1079_v7 = vpop.f32.mrb[9].mxu1 }
 0x359   :  { %1376 = vst.msk [vmem:[#allocation10] sm:$0xff] %vm145_vm0, %v1079_v7 }
 0x35f   :  { %v1692_v3 = vpop.f32.mrb[10].mxu1 }
 0x360   :  { %1379 = vst.msk [vmem:[#allocation10 + $0x18] sm:$0xff] %vm145_vm0, %v1692_v3  ;;  %v1089_v13 = vpop.f32.mrb[11].mxu1 }
 0x361   :  { %1378 = vst.msk [vmem:[#allocation10 + $0x10] sm:$0xff] %vm145_vm0, %v1089_v13 }
 0x363   :  { %v1695_v14 = vpop.f32.mrb[12].mxu1 }
 0x364   :  { %1381 = vst.msk [vmem:[#allocation10 + $0x28] sm:$0xff] %vm145_vm0, %v1695_v14  ;;  %v1099_v16 = vpop.f32.mrb[13].mxu1 }
 0x365   :  { %1380 = vst.msk [vmem:[#allocation10 + $0x20] sm:$0xff] %vm145_vm0, %v1099_v16 }
 0x367   :  { %v1698_v42 = vpop.f32.mrb[14].mxu1 }
 0x368   :  { %1383 = vst.msk [vmem:[#allocation10 + $0x38] sm:$0xff] %vm145_vm0, %v1698_v42  ;;  %v1109_v53 = vpop.f32.mrb[15].mxu1 }
 0x369   :  { %1382 = vst.msk [vmem:[#allocation10 + $0x30] sm:$0xff] %vm145_vm0, %v1109_v53 }
 0x36b   :  { %v1717_v30 = vpop.f32.mrb[16].mxu1 }
 0x36c   :  { %1385 = vst.msk [vmem:[#allocation10 + $0x48] sm:$0xff] %vm145_vm0, %v1717_v30  ;;  %v1208_v57 = vpop.f32.mrb[17].mxu1 }
 0x36d   :  { %1384 = vst.msk [vmem:[#allocation10 + $0x40] sm:$0xff] %vm145_vm0, %v1208_v57 }
 0x36f   :  { %v1720_v58 = vpop.f32.mrb[18].mxu1 }
 0x370   :  { %1387 = vst.msk [vmem:[#allocation10 + $0x58] sm:$0xff] %vm145_vm0, %v1720_v58  ;;  %v1218_v48 = vpop.f32.mrb[19].mxu1 }
 0x371   :  { %1386 = vst.msk [vmem:[#allocation10 + $0x50] sm:$0xff] %vm145_vm0, %v1218_v48 }
 0x373   :  { %v1723_v35 = vpop.f32.mrb[20].mxu1 }
 0x374   :  { %1389 = vst.msk [vmem:[#allocation10 + $0x68] sm:$0xff] %vm145_vm0, %v1723_v35  ;;  %v1228_v4 = vpop.f32.mrb[21].mxu1 }
 0x375   :  { %1388 = vst.msk [vmem:[#allocation10 + $0x60] sm:$0xff] %vm145_vm0, %v1228_v4 }
 0x377   :  { %v1726_v37 = vpop.f32.mrb[22].mxu1 }
 0x378   :  { %1391 = vst.msk [vmem:[#allocation10 + $0x78] sm:$0xff] %vm145_vm0, %v1726_v37  ;;  %v1238_v19 = vpop.f32.mrb[23].mxu1 }
 0x379   :  { %1390 = vst.msk [vmem:[#allocation10 + $0x70] sm:$0xff] %vm145_vm0, %v1238_v19 }
 0x37b   :  { %v1745_v18 = vpop.f32.mrb[16].mxu0 }
 0x37c   :  { %1393 = vst.msk [vmem:[#allocation10 + $0x88] sm:$0xff] %vm145_vm0, %v1745_v18  ;;  %v1337_v23 = vpop.f32.mrb[17].mxu0 }
 0x37d   :  { %1392 = vst.msk [vmem:[#allocation10 + $0x80] sm:$0xff] %vm145_vm0, %v1337_v23 }
 0x380   :  { %v1751_v24 = vpop.f32.mrb[24].mxu1 }
 0x381   :  { %1397 = vst.msk [vmem:[#allocation10 + $0xa8] sm:$0xff] %vm145_vm0, %v1751_v24  ;;  %v1357_v43 = vpop.f32.mrb[25].mxu1 }
 0x382   :  { %1396 = vst.msk [vmem:[#allocation10 + $0xa0] sm:$0xff] %vm145_vm0, %v1357_v43  ;;  %v1748_v39 = vpop.f32.mrb[18].mxu0 }
 0x383   :  { %1395 = vst.msk [vmem:[#allocation10 + $0x98] sm:$0xff] %vm145_vm0, %v1748_v39  ;;  %v1347_v55 = vpop.f32.mrb[19].mxu0 }
 0x384   :  { %1394 = vst.msk [vmem:[#allocation10 + $0x90] sm:$0xff] %vm145_vm0, %v1347_v55 }
 0x387   :  { %v1754_v27 = vpop.f32.mrb[26].mxu1 }
 0x388   :  { %1399 = vst.msk [vmem:[#allocation10 + $0xb8] sm:$0xff] %vm145_vm0, %v1754_v27  ;;  %v1367_v29 = vpop.f32.mrb[27].mxu1 }
 0x389   :  { %1398 = vst.msk [vmem:[#allocation10 + $0xb0] sm:$0xff] %vm145_vm0, %v1367_v29 }
 0x38a   :  { %2085 = shalt.err (!%p2082_p8)
}
 0x38b   :  { %s2086_s15 = scalar_lea.hbm %s2626_s4, 3072 }
 0x38c   :  { %p2087_p9 = scmp.ne.s32.totalorder %s2626_s4, %s2086_s15  ;;  %p2090_p10 = scmp.lt.u32.totalorder %s2086_s15, %s2626_s4 }
 0x38e   :  { %p2092_p11 = pnand %p2090_p10, %p2087_p9 }
 0x390   :  { %2095 = shalt.err (!%p2092_p11)
}
 0x391   :  { %1411 = dma.vmem_to_hbm [thread:$0]  %s1406_s12, 3072, %s2626_s4, [#allocation4], %s2106_s27, %s2106_s27, %s2107_s28  }
 0x392   :  { %2102 = dma.done.wait [#allocation4], 3072  }
 0x393   :  { %2103 = vsyncadd [#allocation4], 4294964224 }
 0x394   :  { %1415 = vsyncpa [#allocation3], 1 }
 0x395   :  { %1416 = vsyncpa [#allocation6], 1 }
 0x396   :  { %1417 = vsyncpa [#allocation9], 1 }
 0x397   :  { %1418 = vsyncpa [#allocation4], 1 }

</bundles_post_ra>
